<compile_context>
chip_gen: v7x
topology: tpu7x:2x2x1
jax: 0.10.0
libtpu: 0.0.40
codegen_flags: <defaults>
</compile_context>

<pallas_src>
import jax
import jax.numpy as jnp
from jax.experimental import pallas as pl
from jax.experimental.pallas import tpu as pltpu


_BLOCK_BUDGET_BYTES = 8 * 1024 * 1024    # per-block target; 2x(in+out) bufs ~= 32 MiB resident
_VMEM_LIMIT_BYTES = 48 * 1024 * 1024     # > v5e 16 MiB default scoped VMEM, < v7x 64 MiB physical
_SMALL_FALLBACK_BYTES = 1 * 1024 * 1024  # below this XLA's fused transpose beats kernel launch cost


def _fit_tile(dim, cap):
    """Largest legal block size for a second-to-last block dim.

    Legal means: equal to the full dim, or a multiple of 8 (TPU (8,128) rule).
    """
    if dim <= cap:
        return dim
    if dim <= 8:
        return dim
    t = (cap // 8) * 8
    return max(8, min(t, dim))


# ---------------------------------------------------------------------------
# Hot path: 4-D channel shuffle, order (0, 2, 1, 3)
# ---------------------------------------------------------------------------

def _permute_0213_kernel(x_ref, o_ref):
    # (tn, G, tc, L) -> (tn, tc, G, L).  The lane (L) axis is unchanged, so
    # this lowers to sublane shuffles that overlap with the block DMAs.
    o_ref[...] = jnp.transpose(x_ref[...], (0, 2, 1, 3))


def _permute_0213(x):
    """x (N, G, C, L) -> (N, C, G, L), i.e. torch .permute(0, 2, 1, 3).contiguous()."""
    n, g, c, l = x.shape
    itemsize = x.dtype.itemsize
    budget_elems = max(1, _BLOCK_BUDGET_BYTES // itemsize)

    # Channels per block: fill the byte budget (multiple of 8 or full C so the
    # input block's second-to-last dim obeys the (8,128) rule).  Packing tc
    # channels per block amortizes per-step overhead and turns every input DMA
    # into a contiguous tc*L run.
    tc = _fit_tile(c, max(1, budget_elems // max(1, g * l)))
    # Batch rows per block with the remaining budget (leading dim: no alignment
    # constraint); pl.cdiv below handles ragged N (no divisor hunting).
    tn = max(1, min(n, budget_elems // max(1, tc * g * l)))

    # v7x has 2 TensorCores sharing "parallel" grid axes: avoid a (1, 1) grid.
    if pl.cdiv(n, tn) == 1 and pl.cdiv(c, tc) == 1 and c > 8:
        cand = (((c + 1) // 2 + 7) // 8) * 8
        if cand < c:
            tc = cand

    grid = (pl.cdiv(n, tn), pl.cdiv(c, tc))

    # Input block:  x[i*tn:(i+1)*tn, :, j*tc:(j+1)*tc, :]   (contiguous tc*L runs)
    in_spec = pl.BlockSpec((tn, g, tc, l), lambda i, j: (i, 0, j, 0))
    # Output block: out[i*tn:(i+1)*tn, j*tc:(j+1)*tc, :, :] (contiguous tc*G*L runs)
    out_spec = pl.BlockSpec((tn, tc, g, l), lambda i, j: (i, j, 0, 0))

    total_bytes = n * g * c * l * itemsize
    return pl.pallas_call(
        _permute_0213_kernel,
        out_shape=jax.ShapeDtypeStruct((n, c, g, l), x.dtype),
        grid=grid,
        in_specs=[in_spec],
        out_specs=out_spec,
        compiler_params=pltpu.CompilerParams(
            dimension_semantics=("parallel", "parallel"),
            vmem_limit_bytes=_VMEM_LIMIT_BYTES,
        ),
        cost_estimate=pl.CostEstimate(
            flops=0, transcendentals=0, bytes_accessed=2 * total_bytes),
    )(x)


# ---------------------------------------------------------------------------
# General path: any permutation (ndim >= 3) that keeps the last axis in place
# ---------------------------------------------------------------------------

def _permute_general(x, order):
    """Budgeted Pallas permute for orders with order[-1] == ndim - 1.

    Blocks keep the input's AND the output's last axis full (long contiguous
    HBM runs on both sides), tile the input's and the output's second-to-last
    source axes to the VMEM byte budget (full or multiple-of-8 per the (8,128)
    rule), and turn every other axis into a grid axis.  The kernel is a
    lane-preserving transpose of the block.
    """
    ndim, shape = x.ndim, x.shape
    itemsize = x.dtype.itemsize
    budget_elems = max(1, _BLOCK_BUDGET_BYTES // itemsize)

    last = ndim - 1
    in_pen = ndim - 2            # input's second-to-last axis
    out_pen = order[-2]          # input axis that becomes output's second-to-last
    l = shape[last]

    tiles = [1] * ndim
    tiles[last] = l
    cap = max(1, budget_elems // max(1, l))
    tiles[out_pen] = _fit_tile(shape[out_pen], cap)
    if in_pen != out_pen:
        tiles[in_pen] = _fit_tile(shape[in_pen], max(1, cap // tiles[out_pen]))

    # One grid axis per input axis except `last`, ordered by output position so
    # consecutive grid steps write consecutive output regions.
    grid_axes = tuple(a for a in order[:-1])
    grid = tuple(pl.cdiv(shape[a], tiles[a]) for a in grid_axes)
    pos = {a: k for k, a in enumerate(grid_axes)}

    in_block = tuple(tiles[a] for a in range(ndim))
    out_block = tuple(tiles[a] for a in order)

    def in_index_map(*g):
        return tuple(0 if a == last else g[pos[a]] for a in range(ndim))

    def out_index_map(*g):
        return tuple(0 if a == last else g[pos[a]] for a in order)

    def kernel(x_ref, o_ref):
        o_ref[...] = jnp.transpose(x_ref[...], order)

    out_dims = tuple(shape[a] for a in order)
    total_bytes = x.size * itemsize
    return pl.pallas_call(
        kernel,
        out_shape=jax.ShapeDtypeStruct(out_dims, x.dtype),
        grid=grid,
        in_specs=[pl.BlockSpec(in_block, in_index_map)],
        out_specs=pl.BlockSpec(out_block, out_index_map),
        compiler_params=pltpu.CompilerParams(
            dimension_semantics=("parallel",) * len(grid),
            vmem_limit_bytes=_VMEM_LIMIT_BYTES,
        ),
        cost_estimate=pl.CostEstimate(
            flops=0, transcendentals=0, bytes_accessed=2 * total_bytes),
    )(x)


# ---------------------------------------------------------------------------
# Dispatcher (== Permute.forward)
# ---------------------------------------------------------------------------

def permute(x, order, *, min_pallas_bytes=_SMALL_FALLBACK_BYTES):
    """Equivalent of Permute(order).forward(x) == x.permute(*order).contiguous()."""
    order = tuple(int(a) for a in order)
    if sorted(order) != list(range(x.ndim)):
        raise ValueError(f"order {order} is not a permutation of {x.ndim} axes")
    if order == tuple(range(x.ndim)):
        return x  # .contiguous() of an already-contiguous tensor is a no-op
    if x.size * x.dtype.itemsize < min_pallas_bytes:
        # Kernel launch + per-step overhead puts a multi-us floor under tiny
        # layers; XLA's fused transpose/copy is cheaper there.
        return jnp.transpose(x, order)
    if x.ndim == 4 and order == (0, 2, 1, 3):
        return _permute_0213(x)                       # channel-shuffle hot path
    if x.ndim >= 3 and order[-1] == x.ndim - 1:
        return _permute_general(x, order)
    # TODO(synk): orders that move the last (lane) axis fall back to XLA's
    # transpose; shufflefacenet never uses them and a lane-moving in-kernel
    # transpose is not worth the lowering risk here.
    return jnp.transpose(x, order)


class Permute:
    """Functional analogue of the PyTorch module."""

    def __init__(self, order):
        self.order = tuple(int(a) for a in order)

    def __call__(self, x):
        return permute(x, self.order)


if __name__ == "__main__":
    key = jax.random.PRNGKey(0)
    # Channel-shuffle style input: (batch, groups, channels_per_group, H*W)
    x = jax.random.normal(key, (2, 4, 16, 16), dtype=jnp.float32)

    # Hot path (order shufflefacenet uses).  Force the Pallas path even though
    # the demo tensor is below the default small-tensor XLA fallback threshold.
    out = jax.block_until_ready(permute(x, (0, 2, 1, 3), min_pallas_bytes=0))
    ref = jnp.transpose(x, (0, 2, 1, 3))
    assert out.shape == ref.shape and out.dtype == x.dtype
    assert bool(jnp.array_equal(out, ref)), "mismatch vs reference permute (0,2,1,3)"

    # General Pallas path: leading-axis permutation on the same tensor.
    out2 = jax.block_until_ready(permute(x, (1, 0, 2, 3), min_pallas_bytes=0))
    assert bool(jnp.array_equal(out2, jnp.transpose(x, (1, 0, 2, 3)))), \
        "mismatch vs reference permute (1,0,2,3)"

    # General Pallas path: swap of two non-minor axes on a 3-D tensor.
    y = jax.random.normal(jax.random.PRNGKey(1), (6, 24, 16), dtype=jnp.float32)
    out3 = jax.block_until_ready(permute(y, (1, 0, 2), min_pallas_bytes=0))
    assert bool(jnp.array_equal(out3, jnp.transpose(y, (1, 0, 2)))), \
        "mismatch vs reference permute (1,0,2)"

    # Default dispatcher through the module-style wrapper (tiny -> XLA fallback).
    out4 = jax.block_until_ready(Permute((0, 2, 1, 3))(x))
    assert bool(jnp.array_equal(out4, ref))

    print("KERNEL_OK")
</pallas_src>

<mosaic_0001>
module attributes {stable_mosaic.version = 11 : i64} {
  func.func @_permute_0213_kernel(%arg0: i32, %arg1: i32, %arg2: memref<2x4x8x16xf32, #tpu.memory_space<vmem>>, %arg3: memref<2x8x4x16xf32, #tpu.memory_space<vmem>>) attributes {dimension_semantics = [#tpu.dimension_semantics<parallel>, #tpu.dimension_semantics<parallel>], iteration_bounds = array<i64: 1, 2>, scalar_prefetch = 0 : i64, scratch_operands = 0 : i64, tpu.core_type = #tpu.core_type<tc>, window_params = [{transform_indices = @transform_0, window_bounds = array<i64: 2, 4, 8, 16>}, {transform_indices = @transform_1, window_bounds = array<i64: 2, 8, 4, 16>}]} {
    %c0 = arith.constant 0 : index
    %c0_0 = arith.constant 0 : index
    %c0_1 = arith.constant 0 : index
    %c0_2 = arith.constant 0 : index
    %0 = vector.load %arg2[%c0, %c0_0, %c0_1, %c0_2] : memref<2x4x8x16xf32, #tpu.memory_space<vmem>>, vector<2x4x8x16xf32>
    %1 = tpu.transpose %0, [0, 2, 1, 3] : vector<2x4x8x16xf32> -> vector<2x8x4x16xf32>
    %c0_3 = arith.constant 0 : index
    %c0_4 = arith.constant 0 : index
    %c0_5 = arith.constant 0 : index
    %c0_6 = arith.constant 0 : index
    %2 = vector.load %arg3[%c0_3, %c0_4, %c0_5, %c0_6] : memref<2x8x4x16xf32, #tpu.memory_space<vmem>>, vector<2x8x4x16xf32>
    tpu.vector_store %arg3[%c0_3, %c0_4, %c0_5, %c0_6], %1 {strides = array<i32>} : memref<2x8x4x16xf32, #tpu.memory_space<vmem>>, vector<2x8x4x16xf32>,
    return
  }
  func.func @transform_0(%arg0: i32, %arg1: i32) -> (i32, i32, i32, i32) {
    %c0_i32 = arith.constant 0 : i32
    %c0_i32_0 = arith.constant 0 : i32
    %c0_i32_1 = arith.constant 0 : i32
    return %arg0, %c0_i32, %arg1, %c0_i32_0 : i32, i32, i32, i32
  }
  func.func @transform_1(%arg0: i32, %arg1: i32) -> (i32, i32, i32, i32) {
    %c0_i32 = arith.constant 0 : i32
    %c0_i32_0 = arith.constant 0 : i32
    %c0_i32_1 = arith.constant 0 : i32
    return %arg0, %arg1, %c0_i32, %c0_i32_0 : i32, i32, i32, i32
  }
}

</mosaic_0001>

<bundles_post_ra>
// kernel: tpu_custom_call.1
= control target key start
LH: loop header
LB: loop body
LE: loop exit
PB: predicated region body
PF: predicated region fallthrough
CT: control target
= control target key end

     0   :  { %6 = vsyncpa [#allocation3], 0  ;;  %s862_s0 = inlined_call_operand.hbm [shape: f32[2,4,16,16], index: 0, kind: input, shape index: {}]   ;;  %s863_s1 = inlined_call_operand.hbm [shape: f32[2,16,4,16], index: 1, kind: output, shape index: {}]  }
   0x1   :  { %8 = vsyncpa [#allocation3 + $0x1], 0 }
   0x2   :  { %9 = vsyncpa [#allocation4], 0 }
   0x3   :  { %11 = vsyncpa [#allocation4 + $0x1], 0  ;;  %s663_s6 = smov 0   ;;  %s665_s7 = smov 0  }
   0x4   :  { %s667_s8 = smov 0   ;;  %s669_s9 = smov 0  }
   0x5   :  { %s671_s10 = smov 0   ;;  %s673_s11 = smov 0  }
   0x6 LB: > { %s449_s12 = sadd.s32 4294967295, %s637_s11   ;;  %s450_s13 = sadd.s32 4294967294, %s637_s11   ;;  %s637_s11 = sphi %s673_s11, %s17_s11   ;;  %s633_s10 = sphi %s671_s10, %s877_s10   ;;  %s629_s9 = sphi %s669_s9, %s876_s9   ;;  %s625_s8 = sphi %s667_s8, %s875_s8   ;;  %s621_s7 = sphi %s665_s7, %s874_s7   ;;  %s617_s6 = sphi %s663_s6, %s873_s6  }
   0x7   : > { %s26_s14 = sadd.s32 1, %s633_s10  ;;  %s38_s15 = sadd.s32 1, %s625_s8 }
   0x8   : > { %p27_p0 = scmp.ge.s32.totalorder %s26_s14, 2  ;;  %p45_p1 = scmp.ne.s32.totalorder %s625_s8, %s621_s7 }
   0x9   : > { %p46_p2 = scmp.eq.s32.totalorder %s637_s11, 0  ;;  %p51_p3 = scmp.ne.s32.totalorder %s621_s7, %s617_s6 }
   0xa   : > { %s879_s14 = smov (%p27_p0, %s26_s14), 0  ;;  %p52_p5 = scmp.eq.s32.totalorder %s449_s12, 0 }
   0xb   : > { %p704_p4 = por %p46_p2, %p45_p1  ;;  %s34_s17 = ssub.s32 %s633_s10, %s879_s14 }
   0xc   : > { %p77_p6 = scmp.eq.s32.totalorder %s449_s12, 1  ;;  %p36_p7 = scmp.eq.s32.totalorder %s34_s17, 0 }
   0xd   : > { %p710_p8 = por %p52_p5, %p51_p3  ;;  %p83_p10 = scmp.eq.s32.totalorder %s450_s13, 1 }
   0xe   : > { %p714_p9 = por %p77_p6, %p45_p1  ;;  %p482_p13 = scmp.lt.s32.totalorder %s637_s11, 2 }
   0xf   : > { %s719_s20 = scalar_select %p36_p7, %s625_s8, %s38_s15  }
  0x10   : > { %s867_s19 = scalar_select %p714_p9, 1, 0 }
  0x11   : > { %p721_p11 = por %p83_p10, %p51_p3  ;;  %s103_s22 = sand.u32 1, %s625_s8  }
  0x12   : > { %s453_s23 = sshll.u32 %s103_s22, 6  ;;  %s454_s24 = sshll.u32 %s633_s10, 7 }
  0x13   : > { %s868_s21 = scalar_select %p721_p11, 1, 0 }
  0x14   : > { %s732_s27 = scalar_lea.hbm %s862_s0, %s454_s24  ;;  %s107_s28 = scalar_lea.vmem [#allocation2], %s453_s23 }
  0x15   : > { %s116_s29 = sshll.u32 %s107_s28, 4  ;;  %p738_p0 = pnand %p482_p13, %p704_p4  ;;  %s734_s29 = int_to_ptr.vmem [resolvable:$true] %s116_s29 }
  0x16   : > { %s742_s2 = scalar_lea.sflag [#allocation3], %s103_s22  ;;  %s553_s3 = scalar_lea.hbm %s732_s27, 1024 }
  0x17   : > { %p554_p1 = scmp.ne.s32.totalorder %s732_s27, %s553_s3  ;;  %p555_p2 = pneg %p738_p0 }
  0x18   : > { %s558_s12 = scalar_lea.hbm %s862_s0, 2048  ;;  %p559_p4 = scmp.lt.u32.totalorder %s732_s27, %s862_s0 }
  0x19   : > { %p556_p3 = pnand %p555_p2, %p554_p1  ;;  %p560_p6 = scmp.lt.u32.totalorder %s558_s12, %s553_s3 }
  0x1a   : > { %p562_p10 = scmp.lt.u32.totalorder %s553_s3, %s732_s27 }
  0x1b   : > { %p557_p5 = pneg %p556_p3  ;;  %p561_p7 = por %p560_p6, %p559_p4 }
  0x1d   : > { %p563_p13 = por %p562_p10, %p561_p7 }
  0x1f   : > { %p564_p12 = pnand %p563_p13, %p557_p5 }
  0x21   : > { %567 = shalt.err (!%p564_p12)
}
  0x22   : > { %s568_s16 = scalar_lea.vmem %s734_s29, 1024  ;;  %s639_s17 = smov [#allocation2]  }
  0x23   : > { %p569_p1 = scmp.ne.s32.totalorder %s734_s29, %s568_s16  ;;  %s573_s22 = sshll.u32 %s639_s17, 4  ;;  %s574_s22 = int_to_ptr.vmem [resolvable:$false] %s573_s22 }
  0x24   : > { %s575_s23 = scalar_lea.vmem %s574_s22, 2048  ;;  %p576_p9 = scmp.lt.s32.totalorder %s734_s29, %s574_s22 }
  0x25   : > { %p571_p3 = pnand %p569_p1, %p555_p2  ;;  %p577_p4 = scmp.lt.s32.totalorder %s575_s23, %s568_s16 }
  0x27   : > { %p572_p11 = pneg %p571_p3  ;;  %p578_p6 = por %p577_p4, %p576_p9 }
  0x29   : > { %p579_p7 = pnand %p578_p6, %p572_p11 }
  0x2b   : > { %582 = shalt.err (!%p579_p7)
}
  0x2c   : > { %s640_s24 = smov 256   ;;  %s641_s25 = smov 128  }
  0x2d   : > { %s642_s26 = smov 8   ;;  %p455_p12 = scmp.ge.s32.totalorder %s637_s11, 1 }
  0x2e   : > { %477 = dma.hbm_to_vmem [thread:$0]  (!%p738_p0), %s732_s27, 1024, %s734_s29, %s742_s2, %s640_s24, %s641_s25, %s642_s26  }
  0x2f   : > { %p124_p2 = scmp.lt.s32.totalorder %s637_s11, 3 }
  0x31   : > { %p125_p5 = pnand %p455_p12, %p124_p2 }
  0x32   : > { %s773_s28 = sand.u32 (!%p125_p5), 1, %s621_s7  }
  0x33   : > { %128 = sbr.rel (%p125_p5) target bundleno = 91 (0x5b), region = 24  ;;  %s456_s3 = sshll.u32 (!%p125_p5), %s773_s28, 6 }
  0x34   : > { %s131_s4 = scalar_lea.sflag (!%p125_p5), [#allocation3], %s773_s28  ;;  %s134_s5 = scalar_lea.vmem (!%p125_p5), [#allocation2], %s456_s3 }
  0x3a   : > { %608 = dma.done.wait (%p710_p8), %s131_s4, 1024  }
  0x3b   : > { %610 = vsyncadd (%p710_p8), %s131_s4, 4294966272  ;;  %v169_v0 = vlaneseq  ;;  %v643_v1 = vmov 1983009808   ;;  %v644_v3 = vmov 1934713408   ;;  %v156_v9 = vld [vmem:[%s134_s5] sm:$0xff] }
  0x3c   : > { %v167_v2 = vunpack.c.l.s4 %v643_v1  ;;  %v199_v4 = vunpack.c.l.s4 %v644_v3  ;;  %v157_v10 = vld [vmem:[%s134_s5 + $0x8] sm:$0xff]  ;;  %v158_v11 = vld [vmem:[%s134_s5 + $0x10] sm:$0xff]  ;;  %v159_v12 = vld [vmem:[%s134_s5 + $0x18] sm:$0xff]  ;;  %vm300_vm0 = vcmask 125952   ;;  %s785_s18 = scalar_lea.vmem [#allocation5], %s456_s3  ;;  %v645_v46 = vmov 0.0  }
  0x3d   : > { %v170_v5 = vshrl.u32 %v169_v0, 7  ;;  %v545_v13 = vld [vmem:[%s134_s5] ss:$16 sps:$4 sm:$0xff]   ;;  %v547_v14 = vld [vmem:[%s134_s5 + $0x8] ss:$16 sps:$4 sm:$0xff]   ;;  %v165_v15 = vcombine.high %v156_v9, %v158_v11  ;;  %v181_v17 = vcombine.high %v157_v10, %v159_v12  ;;  %s318_s27 = scalar_lea.sflag [#allocation4], %s773_s28 }
  0x3e   : > { %v168_v6 = vunpack.c.0.s8 %v167_v2  ;;  %v200_v7 = vunpack.c.0.s8 %v199_v4  ;;  %v160_v18 = vld [vmem:[%s134_s5 + $0x20] sm:$0xff]  ;;  %v161_v19 = vld [vmem:[%s134_s5 + $0x28] sm:$0xff]  ;;  %v162_v20 = vld [vmem:[%s134_s5 + $0x30] sm:$0xff] }
  0x3f   : > { %v163_v24 = vld [vmem:[%s134_s5 + $0x38] sm:$0xff]  ;;  %v549_v25 = vld [vmem:[%s134_s5 + $0x20] ss:$16 sps:$4 sm:$0xff]   ;;  %v233_v27 = vcombine.high %v160_v18, %v162_v20 }
  0x40   : > { %v171_v8 = vsub.s32 %v168_v6, %v170_v5  ;;  %v203_v16 = vsub.s32 %v200_v7, %v170_v5  ;;  %v551_v26 = vld [vmem:[%s134_s5 + $0x28] ss:$16 sps:$4 sm:$0xff]   ;;  %v249_v29 = vcombine.high %v161_v19, %v163_v24 }
  0x42   : > { %v172_v21 = vrot.slane %v545_v13, %v171_v8  ;;  %v188_v22 = vrot.slane %v547_v14, %v171_v8  ;;  %v179_v23 = vrot.slane %v165_v15, %v171_v8  ;;  %v195_v28 = vrot.slane %v181_v17, %v171_v8 }
  0x43   : > { %v240_v32 = vrot.slane %v549_v25, %v171_v8  ;;  %v256_v33 = vrot.slane %v551_v26, %v171_v8  ;;  %v247_v36 = vrot.slane %v233_v27, %v171_v8  ;;  %v263_v37 = vrot.slane %v249_v29, %v171_v8 }
  0x44   : > { %v196_v30 = vcombine.low %v172_v21, %v188_v22  ;;  %v197_v31 = vcombine.high %v172_v21, %v188_v22  ;;  %v212_v34 = vcombine.low %v179_v23, %v195_v28  ;;  %v213_v35 = vcombine.high %v179_v23, %v195_v28 }
  0x45   : > { %v264_v40 = vcombine.low %v240_v32, %v256_v33  ;;  %v265_v41 = vcombine.high %v240_v32, %v256_v33  ;;  %v280_v44 = vcombine.low %v247_v36, %v263_v37  ;;  %v281_v45 = vcombine.high %v247_v36, %v263_v37 }
  0x46   : > { %v204_v38 = vrot.slane %v196_v30, %v203_v16  ;;  %v211_v39 = vrot.slane %v197_v31, %v203_v16  ;;  %v220_v42 = vrot.slane %v212_v34, %v203_v16  ;;  %v227_v43 = vrot.slane %v213_v35, %v203_v16 }
  0x47   : > { %v272_v49 = vrot.slane %v264_v40, %v203_v16  ;;  %v279_v50 = vrot.slane %v265_v41, %v203_v16  ;;  %v288_v53 = vrot.slane %v280_v44, %v203_v16  ;;  %v295_v54 = vrot.slane %v281_v45, %v203_v16 }
  0x48   : > { %301 = vst.msk [vmem:[%s785_s18] sm:$0xf] %vm300_vm0, %v204_v38  ;;  %v228_v47 = vcombine.high %v204_v38, %v645_v46  ;;  %303 = vst.msk [vmem:[%s785_s18 + $0x8] sm:$0xf] %vm300_vm0, %v211_v39  ;;  %v229_v48 = vcombine.high %v211_v39, %v645_v46  ;;  %v230_v51 = vcombine.high %v220_v42, %v645_v46 }
  0x49   : > { %305 = vst.msk [vmem:[%s785_s18 + $0x10] sm:$0xf] %vm300_vm0, %v220_v42  ;;  %307 = vst.msk [vmem:[%s785_s18 + $0x18] sm:$0xf] %vm300_vm0, %v227_v43  ;;  %v231_v52 = vcombine.high %v227_v43, %v645_v46  ;;  %v296_v55 = vcombine.high %v272_v49, %v645_v46  ;;  %v297_v56 = vcombine.high %v279_v50, %v645_v46 }
  0x4a   : > { %302 = vst.msk [vmem:[%s785_s18 + $0x4] sm:$0xf] %vm300_vm0, %v228_v47  ;;  %304 = vst.msk [vmem:[%s785_s18 + $0xc] sm:$0xf] %vm300_vm0, %v229_v48  ;;  %v298_v57 = vcombine.high %v288_v53, %v645_v46  ;;  %v299_v58 = vcombine.high %v295_v54, %v645_v46 }
  0x4b   : > { %309 = vst.msk [vmem:[%s785_s18 + $0x20] sm:$0xf] %vm300_vm0, %v272_v49  ;;  %311 = vst.msk [vmem:[%s785_s18 + $0x28] sm:$0xf] %vm300_vm0, %v279_v50 }
  0x4c   : > { %306 = vst.msk [vmem:[%s785_s18 + $0x14] sm:$0xf] %vm300_vm0, %v230_v51  ;;  %308 = vst.msk [vmem:[%s785_s18 + $0x1c] sm:$0xf] %vm300_vm0, %v231_v52 }
  0x4d   : > { %313 = vst.msk [vmem:[%s785_s18 + $0x30] sm:$0xf] %vm300_vm0, %v288_v53  ;;  %315 = vst.msk [vmem:[%s785_s18 + $0x38] sm:$0xf] %vm300_vm0, %v295_v54 }
  0x4e   : > { %310 = vst.msk [vmem:[%s785_s18 + $0x24] sm:$0xf] %vm300_vm0, %v296_v55  ;;  %312 = vst.msk [vmem:[%s785_s18 + $0x2c] sm:$0xf] %vm300_vm0, %v297_v56 }
  0x4f   : > { %314 = vst.msk [vmem:[%s785_s18 + $0x34] sm:$0xf] %vm300_vm0, %v298_v57  ;;  %316 = vst.msk [vmem:[%s785_s18 + $0x3c] sm:$0xf] %vm300_vm0, %v299_v58 }
  0x50   : > { %s463_s29 = sshll.u32 %s629_s9, 9  ;;  %s350_s30 = sshll.u32 %s785_s18, 4  ;;  %s351_s30 = int_to_ptr.vmem [resolvable:$true] %s350_s30 }
  0x51   : > { %s333_s13 = scalar_lea.hbm %s863_s1, %s463_s29  ;;  %s646_s15 = smov 512  }
  0x52   : > { %p870_p8 = scmp.ne.s32.totalorder %s867_s19, 0  ;;  %s647_s16 = smov 1024  }
  0x53   : > { %s648_s17 = smov 8   ;;  %s649_s22 = smov 64  }
  0x54   : > { %466 = sst [smem:[#allocation7]] (%p870_p8), %s646_s15  ;;  %s650_s9 = smov 4  }
  0x55   : > { %467 = sst [smem:[#allocation7 + $0x1]] (%p870_p8), %s647_s16  ;;  %s651_s23 = smov [#allocation6]  }
  0x56   : > { %468 = sst [smem:[#allocation7 + $0x2]] (%p870_p8), %s648_s17  ;;  %s652_s24 = smov 0  }
  0x57   : > { %469 = sst [smem:[#allocation7 + $0x3]] (%p870_p8), %s649_s22 }
  0x58   : > { %470 = sst [smem:[#allocation7 + $0x4]] (%p870_p8), %s649_s22 }
  0x59   : > { %471 = sst [smem:[#allocation7 + $0x5]] (%p870_p8), %s650_s9 }
  0x5a   : > { %472 = dma.general (%p870_p8), %s351_s30, 1024, %s333_s13, %s318_s27, %s651_s23, [#allocation7], %s652_s24, 0  }
  0x5b PF: > { %s378_s25 = sand.u32 1, %s617_s6   ;;  %p871_p9 = scmp.ne.s32.totalorder %s868_s21, 0 }
  0x5c   : > { %p872_p11 = scmp.ge.s32.totalorder %s637_s11, 2  ;;  %s379_s26 = scalar_lea.sflag [#allocation4], %s378_s25 }
  0x5e   : > { %p479_p0 = pnand %p872_p11, %p871_p9 }
  0x60   : > { %612 = dma.done.wait (!%p479_p0), %s379_s26, 1024  }
  0x61   : > { %614 = vsyncadd (!%p479_p0), %s379_s26, 4294966272  ;;  %s17_s11 = sadd.s32 1, %s637_s11   ;;  %s873_s6 = smov %s621_s7 }
  0x62   : > { %p14_p10 = scmp.ge.s32.totalorder %s17_s11, 4   ;;  %s874_s7 = smov %s625_s8 }
  0x63   : > { %s875_s8 = smov %s719_s20  ;;  %s876_s9 = smov %s633_s10 }
  0x64   : > { %s877_s10 = smov %s879_s14  ;;  %16 = sbr.rel (!%p14_p10) target bundleno = 6 (0x6), region = 74 }
  0x6b   :  { %384 = vsyncpa [#allocation3], 1 }
  0x6c   :  { %386 = vsyncpa [#allocation3 + $0x1], 1 }
  0x6d   :  { %387 = vsyncpa [#allocation4], 1 }
  0x6e   :  { %389 = vsyncpa [#allocation4 + $0x1], 1 }

</bundles_post_ra>
